<compile_context>
chip_gen: v5e
topology: v5e:2x2
jax: 0.10.0
libtpu: 0.0.40
codegen_flags: <defaults>
</compile_context>

<pallas_src>
import functools

import jax
import jax.numpy as jnp
from jax.experimental import pallas as pl
from jax.experimental.pallas import tpu as pltpu


def _round_up(x, m):
    return ((x + m - 1) // m) * m


def _leaky_relu(x, neg_slope):
    return jnp.where(x >= 0, x, jnp.float32(neg_slope) * x)


def make_discriminator_kernel(neg_slope, tb, compute_dtype):
    """Kernel over one (tb, D_in) batch tile; weights resident in VMEM."""
    half = tb // 2  # tb is always a multiple of 16 -> half is a multiple of 8

    def layer(x_f32, w, b, act):
        y = jnp.dot(x_f32.astype(compute_dtype), w,
                    preferred_element_type=jnp.float32)
        y = y + b  # b is (1, out) f32, broadcasts over the batch rows
        if act:
            y = _leaky_relu(y, neg_slope)
        return y

    def kernel(z_ref,
               w1, b1, w2, b2, w3, b3, w4, b4, w5, b5, w6, b6, w7, b7,
               out_ref):
        layers = ((w1, b1), (w2, b2), (w3, b3), (w4, b4),
                  (w5, b5), (w6, b6), (w7, b7))

        x = z_ref[...]                 # (tb, D_in) f32
        xa = x[:half]                  # two independent sub-chains ->
        xb = x[half:]                  # interleaved MXU work per layer

        for idx, (w_ref, b_ref) in enumerate(layers):
            w = w_ref[...]             # bf16 (in_pad, out_pad)
            b = b_ref[...]             # f32  (1, out_pad)
            act = idx < 6
            xa = layer(xa, w, b, act)
            xb = layer(xb, w, b, act)

        out_ref[:half, :] = xa.astype(out_ref.dtype)
        out_ref[half:, :] = xb.astype(out_ref.dtype)

    return kernel


def factor_discriminator(z, params, neg_slope, *,
                         compute_dtype=jnp.bfloat16, tb_max=128):
    """z: (B, latent_dim) f32; params: list of 7 (W (in,out), b (out,)) f32."""
    dims = [params[0][0].shape[0]] + [w.shape[1] for w, _ in params]
    pdims = [_round_up(d, 128) for d in dims]

    B = z.shape[0]
    TB = min(tb_max, _round_up(max(B, 1), 16))
    B_pad = _round_up(B, TB)
    grid = (B_pad // TB,)

    # Pad + cast parameters (zero padding is inert for the forward pass).
    flat = []
    for li, (w, b) in enumerate(params):
        wp = jnp.zeros((pdims[li], pdims[li + 1]), compute_dtype)
        wp = wp.at[:dims[li], :dims[li + 1]].set(w.astype(compute_dtype))
        bp = jnp.zeros((1, pdims[li + 1]), jnp.float32)
        bp = bp.at[:, :dims[li + 1]].set(b.reshape(1, -1).astype(jnp.float32))
        flat += [wp, bp]

    z_pad = jnp.zeros((B_pad, pdims[0]), jnp.float32)
    z_pad = z_pad.at[:B, :dims[0]].set(z.astype(jnp.float32))

    # Block specs: batch-tiled activations, VMEM-resident weights/biases.
    in_specs = [pl.BlockSpec((TB, pdims[0]), lambda i: (i, 0))]
    for li in range(7):
        in_specs.append(pl.BlockSpec((pdims[li], pdims[li + 1]),
                                     lambda i: (0, 0)))
        in_specs.append(pl.BlockSpec((1, pdims[li + 1]), lambda i: (0, 0)))
    out_spec = pl.BlockSpec((TB, pdims[-1]), lambda i: (i, 0))

    # Cost / memory hints.
    itemsize_w = jnp.dtype(compute_dtype).itemsize
    weight_bytes = sum(pdims[i] * pdims[i + 1] * itemsize_w + pdims[i + 1] * 4
                       for i in range(7))
    act_tile_bytes = TB * (pdims[0] + pdims[-1]) * 4
    flops = 2 * B_pad * sum(pdims[i] * pdims[i + 1] for i in range(7))
    bytes_accessed = (B_pad * pdims[0] * 4 + B_pad * pdims[-1] * 4
                      + weight_bytes)
    vmem_limit = int(max(2 * (weight_bytes + 2 * act_tile_bytes) + (4 << 20),
                         32 << 20))

    kernel = make_discriminator_kernel(neg_slope, TB, compute_dtype)

    out = pl.pallas_call(
        kernel,
        out_shape=jax.ShapeDtypeStruct((B_pad, pdims[-1]), jnp.float32),
        grid=grid,
        in_specs=in_specs,
        out_specs=out_spec,
        compiler_params=pltpu.CompilerParams(
            dimension_semantics=("parallel",),
            vmem_limit_bytes=vmem_limit),
        cost_estimate=pl.CostEstimate(flops=flops, transcendentals=0,
                                      bytes_accessed=bytes_accessed),
    )(z_pad, *flat)

    return out[:B, :dims[-1]]


def init_params(key, latent_dim, hidden_units, out_units=2):
    """Deterministic synthetic init; W stored as (in, out), b as (out,)."""
    dims = [latent_dim] + [hidden_units] * 6 + [out_units]
    params = []
    for i in range(7):
        key, kw, kb = jax.random.split(key, 3)
        fan_in = dims[i]
        w = jax.random.normal(kw, (dims[i], dims[i + 1]), jnp.float32) \
            / jnp.sqrt(jnp.float32(fan_in))
        b = jax.random.normal(kb, (dims[i + 1],), jnp.float32) * 0.01
        params.append((w, b))
    return params


def reference_forward(z, params, neg_slope, compute_dtype=jnp.bfloat16):
    """Pure-JAX reference using the same bf16-input / f32-accumulate recipe."""
    x = z.astype(jnp.float32)
    for i, (w, b) in enumerate(params):
        y = jnp.dot(x.astype(compute_dtype), w.astype(compute_dtype),
                    preferred_element_type=jnp.float32)
        y = y + b.reshape(1, -1).astype(jnp.float32)
        x = jnp.where(y >= 0, y, neg_slope * y) if i < 6 else y
    return x


if __name__ == "__main__":
    neg_slope = 0.2
    latent_dim = 10
    hidden_units = 32
    batch = 8

    key = jax.random.PRNGKey(0)
    key, kz = jax.random.split(key)
    z = jax.random.normal(kz, (batch, latent_dim), jnp.float32)

    params = init_params(key, latent_dim, hidden_units)

    run = functools.partial(factor_discriminator, neg_slope=neg_slope)
    out = jax.block_until_ready(run(z, params))

    ref = reference_forward(z, params, neg_slope)
    assert out.shape == (batch, 2), out.shape
    assert jnp.allclose(out, ref, atol=1e-2, rtol=1e-2), \
        f"mismatch vs reference: max abs err {jnp.max(jnp.abs(out - ref))}"

    print("KERNEL_OK")
</pallas_src>

<mosaic_0001>
module attributes {stable_mosaic.version = 11 : i64} {
  func.func @kernel(%arg0: i32, %arg1: memref<16x128xf32, #tpu.memory_space<vmem>>, %arg2: memref<128x128xbf16, #tpu.memory_space<vmem>>, %arg3: memref<1x128xf32, #tpu.memory_space<vmem>>, %arg4: memref<128x128xbf16, #tpu.memory_space<vmem>>, %arg5: memref<1x128xf32, #tpu.memory_space<vmem>>, %arg6: memref<128x128xbf16, #tpu.memory_space<vmem>>, %arg7: memref<1x128xf32, #tpu.memory_space<vmem>>, %arg8: memref<128x128xbf16, #tpu.memory_space<vmem>>, %arg9: memref<1x128xf32, #tpu.memory_space<vmem>>, %arg10: memref<128x128xbf16, #tpu.memory_space<vmem>>, %arg11: memref<1x128xf32, #tpu.memory_space<vmem>>, %arg12: memref<128x128xbf16, #tpu.memory_space<vmem>>, %arg13: memref<1x128xf32, #tpu.memory_space<vmem>>, %arg14: memref<128x128xbf16, #tpu.memory_space<vmem>>, %arg15: memref<1x128xf32, #tpu.memory_space<vmem>>, %arg16: memref<16x128xf32, #tpu.memory_space<vmem>>) attributes {dimension_semantics = [#tpu.dimension_semantics<parallel>], iteration_bounds = array<i64: 1>, scalar_prefetch = 0 : i64, scratch_operands = 0 : i64, tpu.core_type = #tpu.core_type<tc>, window_params = [{transform_indices = @transform_0, window_bounds = array<i64: 16, 128>}, {pipeline_mode = #tpu.pipeline_mode<synchronous>, transform_indices = @transform_1, window_bounds = array<i64: 128, 128>}, {pipeline_mode = #tpu.pipeline_mode<synchronous>, transform_indices = @transform_2, window_bounds = array<i64: 1, 128>}, {pipeline_mode = #tpu.pipeline_mode<synchronous>, transform_indices = @transform_3, window_bounds = array<i64: 128, 128>}, {pipeline_mode = #tpu.pipeline_mode<synchronous>, transform_indices = @transform_4, window_bounds = array<i64: 1, 128>}, {pipeline_mode = #tpu.pipeline_mode<synchronous>, transform_indices = @transform_5, window_bounds = array<i64: 128, 128>}, {pipeline_mode = #tpu.pipeline_mode<synchronous>, transform_indices = @transform_6, window_bounds = array<i64: 1, 128>}, {pipeline_mode = #tpu.pipeline_mode<synchronous>, transform_indices = @transform_7, window_bounds = array<i64: 128, 128>}, {pipeline_mode = #tpu.pipeline_mode<synchronous>, transform_indices = @transform_8, window_bounds = array<i64: 1, 128>}, {pipeline_mode = #tpu.pipeline_mode<synchronous>, transform_indices = @transform_9, window_bounds = array<i64: 128, 128>}, {pipeline_mode = #tpu.pipeline_mode<synchronous>, transform_indices = @transform_10, window_bounds = array<i64: 1, 128>}, {pipeline_mode = #tpu.pipeline_mode<synchronous>, transform_indices = @transform_11, window_bounds = array<i64: 128, 128>}, {pipeline_mode = #tpu.pipeline_mode<synchronous>, transform_indices = @transform_12, window_bounds = array<i64: 1, 128>}, {pipeline_mode = #tpu.pipeline_mode<synchronous>, transform_indices = @transform_13, window_bounds = array<i64: 128, 128>}, {pipeline_mode = #tpu.pipeline_mode<synchronous>, transform_indices = @transform_14, window_bounds = array<i64: 1, 128>}, {transform_indices = @transform_15, window_bounds = array<i64: 16, 128>}]} {
    %c0 = arith.constant 0 : index
    %c0_0 = arith.constant 0 : index
    %0 = vector.load %arg1[%c0, %c0_0] : memref<16x128xf32, #tpu.memory_space<vmem>>, vector<16x128xf32>
    %1 = vector.extract_strided_slice %0 {offsets = [0, 0], sizes = [8, 128], strides = [1, 1]} : vector<16x128xf32> to vector<8x128xf32>
    %2 = vector.extract_strided_slice %0 {offsets = [8, 0], sizes = [8, 128], strides = [1, 1]} : vector<16x128xf32> to vector<8x128xf32>
    %c0_1 = arith.constant 0 : index
    %c0_2 = arith.constant 0 : index
    %3 = vector.load %arg2[%c0_1, %c0_2] : memref<128x128xbf16, #tpu.memory_space<vmem>>, vector<128x128xbf16>
    %c0_3 = arith.constant 0 : index
    %c0_4 = arith.constant 0 : index
    %4 = vector.load %arg3[%c0_3, %c0_4] : memref<1x128xf32, #tpu.memory_space<vmem>>, vector<1x128xf32>
    %5 = arith.truncf %1 : vector<8x128xf32> to vector<8x128xbf16>
    %cst = arith.constant dense<0.000000e+00> : vector<8x128xf32>
    %6 = tpu.matmul %5, %3, %cst {dimension_numbers = #tpu.dot_dimension_numbers<[1], [0], [0], [1], [0, 0, 1, 1], [], []>} : vector<8x128xbf16>, vector<128x128xbf16>, vector<8x128xf32> -> vector<8x128xf32>
    %7 = vector.broadcast %4 : vector<1x128xf32> to vector<8x128xf32>
    %8 = arith.addf %6, %7 : vector<8x128xf32>
    %cst_5 = arith.constant 0.000000e+00 : f32
    %9 = vector.broadcast %cst_5 : f32 to vector<8x128xf32>
    %10 = arith.cmpf oge, %8, %9 : vector<8x128xf32>
    %cst_6 = arith.constant 2.000000e-01 : f32
    %11 = vector.broadcast %cst_6 : f32 to vector<8x128xf32>
    %12 = arith.mulf %11, %8 : vector<8x128xf32>
    %13 = arith.select %10, %8, %12 : vector<8x128xi1>, vector<8x128xf32>
    %14 = arith.truncf %2 : vector<8x128xf32> to vector<8x128xbf16>
    %cst_7 = arith.constant dense<0.000000e+00> : vector<8x128xf32>
    %15 = tpu.matmul %14, %3, %cst_7 {dimension_numbers = #tpu.dot_dimension_numbers<[1], [0], [0], [1], [0, 0, 1, 1], [], []>} : vector<8x128xbf16>, vector<128x128xbf16>, vector<8x128xf32> -> vector<8x128xf32>
    %16 = vector.broadcast %4 : vector<1x128xf32> to vector<8x128xf32>
    %17 = arith.addf %15, %16 : vector<8x128xf32>
    %cst_8 = arith.constant 0.000000e+00 : f32
    %18 = vector.broadcast %cst_8 : f32 to vector<8x128xf32>
    %19 = arith.cmpf oge, %17, %18 : vector<8x128xf32>
    %cst_9 = arith.constant 2.000000e-01 : f32
    %20 = vector.broadcast %cst_9 : f32 to vector<8x128xf32>
    %21 = arith.mulf %20, %17 : vector<8x128xf32>
    %22 = arith.select %19, %17, %21 : vector<8x128xi1>, vector<8x128xf32>
    %c0_10 = arith.constant 0 : index
    %c0_11 = arith.constant 0 : index
    %23 = vector.load %arg4[%c0_10, %c0_11] : memref<128x128xbf16, #tpu.memory_space<vmem>>, vector<128x128xbf16>
    %c0_12 = arith.constant 0 : index
    %c0_13 = arith.constant 0 : index
    %24 = vector.load %arg5[%c0_12, %c0_13] : memref<1x128xf32, #tpu.memory_space<vmem>>, vector<1x128xf32>
    %25 = arith.truncf %13 : vector<8x128xf32> to vector<8x128xbf16>
    %cst_14 = arith.constant dense<0.000000e+00> : vector<8x128xf32>
    %26 = tpu.matmul %25, %23, %cst_14 {dimension_numbers = #tpu.dot_dimension_numbers<[1], [0], [0], [1], [0, 0, 1, 1], [], []>} : vector<8x128xbf16>, vector<128x128xbf16>, vector<8x128xf32> -> vector<8x128xf32>
    %27 = vector.broadcast %24 : vector<1x128xf32> to vector<8x128xf32>
    %28 = arith.addf %26, %27 : vector<8x128xf32>
    %cst_15 = arith.constant 0.000000e+00 : f32
    %29 = vector.broadcast %cst_15 : f32 to vector<8x128xf32>
    %30 = arith.cmpf oge, %28, %29 : vector<8x128xf32>
    %cst_16 = arith.constant 2.000000e-01 : f32
    %31 = vector.broadcast %cst_16 : f32 to vector<8x128xf32>
    %32 = arith.mulf %31, %28 : vector<8x128xf32>
    %33 = arith.select %30, %28, %32 : vector<8x128xi1>, vector<8x128xf32>
    %34 = arith.truncf %22 : vector<8x128xf32> to vector<8x128xbf16>
    %cst_17 = arith.constant dense<0.000000e+00> : vector<8x128xf32>
    %35 = tpu.matmul %34, %23, %cst_17 {dimension_numbers = #tpu.dot_dimension_numbers<[1], [0], [0], [1], [0, 0, 1, 1], [], []>} : vector<8x128xbf16>, vector<128x128xbf16>, vector<8x128xf32> -> vector<8x128xf32>
    %36 = vector.broadcast %24 : vector<1x128xf32> to vector<8x128xf32>
    %37 = arith.addf %35, %36 : vector<8x128xf32>
    %cst_18 = arith.constant 0.000000e+00 : f32
    %38 = vector.broadcast %cst_18 : f32 to vector<8x128xf32>
    %39 = arith.cmpf oge, %37, %38 : vector<8x128xf32>
    %cst_19 = arith.constant 2.000000e-01 : f32
    %40 = vector.broadcast %cst_19 : f32 to vector<8x128xf32>
    %41 = arith.mulf %40, %37 : vector<8x128xf32>
    %42 = arith.select %39, %37, %41 : vector<8x128xi1>, vector<8x128xf32>
    %c0_20 = arith.constant 0 : index
    %c0_21 = arith.constant 0 : index
    %43 = vector.load %arg6[%c0_20, %c0_21] : memref<128x128xbf16, #tpu.memory_space<vmem>>, vector<128x128xbf16>
    %c0_22 = arith.constant 0 : index
    %c0_23 = arith.constant 0 : index
    %44 = vector.load %arg7[%c0_22, %c0_23] : memref<1x128xf32, #tpu.memory_space<vmem>>, vector<1x128xf32>
    %45 = arith.truncf %33 : vector<8x128xf32> to vector<8x128xbf16>
    %cst_24 = arith.constant dense<0.000000e+00> : vector<8x128xf32>
    %46 = tpu.matmul %45, %43, %cst_24 {dimension_numbers = #tpu.dot_dimension_numbers<[1], [0], [0], [1], [0, 0, 1, 1], [], []>} : vector<8x128xbf16>, vector<128x128xbf16>, vector<8x128xf32> -> vector<8x128xf32>
    %47 = vector.broadcast %44 : vector<1x128xf32> to vector<8x128xf32>
    %48 = arith.addf %46, %47 : vector<8x128xf32>
    %cst_25 = arith.constant 0.000000e+00 : f32
    %49 = vector.broadcast %cst_25 : f32 to vector<8x128xf32>
    %50 = arith.cmpf oge, %48, %49 : vector<8x128xf32>
    %cst_26 = arith.constant 2.000000e-01 : f32
    %51 = vector.broadcast %cst_26 : f32 to vector<8x128xf32>
    %52 = arith.mulf %51, %48 : vector<8x128xf32>
    %53 = arith.select %50, %48, %52 : vector<8x128xi1>, vector<8x128xf32>
    %54 = arith.truncf %42 : vector<8x128xf32> to vector<8x128xbf16>
    %cst_27 = arith.constant dense<0.000000e+00> : vector<8x128xf32>
    %55 = tpu.matmul %54, %43, %cst_27 {dimension_numbers = #tpu.dot_dimension_numbers<[1], [0], [0], [1], [0, 0, 1, 1], [], []>} : vector<8x128xbf16>, vector<128x128xbf16>, vector<8x128xf32> -> vector<8x128xf32>
    %56 = vector.broadcast %44 : vector<1x128xf32> to vector<8x128xf32>
    %57 = arith.addf %55, %56 : vector<8x128xf32>
    %cst_28 = arith.constant 0.000000e+00 : f32
    %58 = vector.broadcast %cst_28 : f32 to vector<8x128xf32>
    %59 = arith.cmpf oge, %57, %58 : vector<8x128xf32>
    %cst_29 = arith.constant 2.000000e-01 : f32
    %60 = vector.broadcast %cst_29 : f32 to vector<8x128xf32>
    %61 = arith.mulf %60, %57 : vector<8x128xf32>
    %62 = arith.select %59, %57, %61 : vector<8x128xi1>, vector<8x128xf32>
    %c0_30 = arith.constant 0 : index
    %c0_31 = arith.constant 0 : index
    %63 = vector.load %arg8[%c0_30, %c0_31] : memref<128x128xbf16, #tpu.memory_space<vmem>>, vector<128x128xbf16>
    %c0_32 = arith.constant 0 : index
    %c0_33 = arith.constant 0 : index
    %64 = vector.load %arg9[%c0_32, %c0_33] : memref<1x128xf32, #tpu.memory_space<vmem>>, vector<1x128xf32>
    %65 = arith.truncf %53 : vector<8x128xf32> to vector<8x128xbf16>
    %cst_34 = arith.constant dense<0.000000e+00> : vector<8x128xf32>
    %66 = tpu.matmul %65, %63, %cst_34 {dimension_numbers = #tpu.dot_dimension_numbers<[1], [0], [0], [1], [0, 0, 1, 1], [], []>} : vector<8x128xbf16>, vector<128x128xbf16>, vector<8x128xf32> -> vector<8x128xf32>
    %67 = vector.broadcast %64 : vector<1x128xf32> to vector<8x128xf32>
    %68 = arith.addf %66, %67 : vector<8x128xf32>
    %cst_35 = arith.constant 0.000000e+00 : f32
    %69 = vector.broadcast %cst_35 : f32 to vector<8x128xf32>
    %70 = arith.cmpf oge, %68, %69 : vector<8x128xf32>
    %cst_36 = arith.constant 2.000000e-01 : f32
    %71 = vector.broadcast %cst_36 : f32 to vector<8x128xf32>
    %72 = arith.mulf %71, %68 : vector<8x128xf32>
    %73 = arith.select %70, %68, %72 : vector<8x128xi1>, vector<8x128xf32>
    %74 = arith.truncf %62 : vector<8x128xf32> to vector<8x128xbf16>
    %cst_37 = arith.constant dense<0.000000e+00> : vector<8x128xf32>
    %75 = tpu.matmul %74, %63, %cst_37 {dimension_numbers = #tpu.dot_dimension_numbers<[1], [0], [0], [1], [0, 0, 1, 1], [], []>} : vector<8x128xbf16>, vector<128x128xbf16>, vector<8x128xf32> -> vector<8x128xf32>
    %76 = vector.broadcast %64 : vector<1x128xf32> to vector<8x128xf32>
    %77 = arith.addf %75, %76 : vector<8x128xf32>
    %cst_38 = arith.constant 0.000000e+00 : f32
    %78 = vector.broadcast %cst_38 : f32 to vector<8x128xf32>
    %79 = arith.cmpf oge, %77, %78 : vector<8x128xf32>
    %cst_39 = arith.constant 2.000000e-01 : f32
    %80 = vector.broadcast %cst_39 : f32 to vector<8x128xf32>
    %81 = arith.mulf %80, %77 : vector<8x128xf32>
    %82 = arith.select %79, %77, %81 : vector<8x128xi1>, vector<8x128xf32>
    %c0_40 = arith.constant 0 : index
    %c0_41 = arith.constant 0 : index
    %83 = vector.load %arg10[%c0_40, %c0_41] : memref<128x128xbf16, #tpu.memory_space<vmem>>, vector<128x128xbf16>
    %c0_42 = arith.constant 0 : index
    %c0_43 = arith.constant 0 : index
    %84 = vector.load %arg11[%c0_42, %c0_43] : memref<1x128xf32, #tpu.memory_space<vmem>>, vector<1x128xf32>
    %85 = arith.truncf %73 : vector<8x128xf32> to vector<8x128xbf16>
    %cst_44 = arith.constant dense<0.000000e+00> : vector<8x128xf32>
    %86 = tpu.matmul %85, %83, %cst_44 {dimension_numbers = #tpu.dot_dimension_numbers<[1], [0], [0], [1], [0, 0, 1, 1], [], []>} : vector<8x128xbf16>, vector<128x128xbf16>, vector<8x128xf32> -> vector<8x128xf32>
    %87 = vector.broadcast %84 : vector<1x128xf32> to vector<8x128xf32>
    %88 = arith.addf %86, %87 : vector<8x128xf32>
    %cst_45 = arith.constant 0.000000e+00 : f32
    %89 = vector.broadcast %cst_45 : f32 to vector<8x128xf32>
    %90 = arith.cmpf oge, %88, %89 : vector<8x128xf32>
    %cst_46 = arith.constant 2.000000e-01 : f32
    %91 = vector.broadcast %cst_46 : f32 to vector<8x128xf32>
    %92 = arith.mulf %91, %88 : vector<8x128xf32>
    %93 = arith.select %90, %88, %92 : vector<8x128xi1>, vector<8x128xf32>
    %94 = arith.truncf %82 : vector<8x128xf32> to vector<8x128xbf16>
    %cst_47 = arith.constant dense<0.000000e+00> : vector<8x128xf32>
    %95 = tpu.matmul %94, %83, %cst_47 {dimension_numbers = #tpu.dot_dimension_numbers<[1], [0], [0], [1], [0, 0, 1, 1], [], []>} : vector<8x128xbf16>, vector<128x128xbf16>, vector<8x128xf32> -> vector<8x128xf32>
    %96 = vector.broadcast %84 : vector<1x128xf32> to vector<8x128xf32>
    %97 = arith.addf %95, %96 : vector<8x128xf32>
    %cst_48 = arith.constant 0.000000e+00 : f32
    %98 = vector.broadcast %cst_48 : f32 to vector<8x128xf32>
    %99 = arith.cmpf oge, %97, %98 : vector<8x128xf32>
    %cst_49 = arith.constant 2.000000e-01 : f32
    %100 = vector.broadcast %cst_49 : f32 to vector<8x128xf32>
    %101 = arith.mulf %100, %97 : vector<8x128xf32>
    %102 = arith.select %99, %97, %101 : vector<8x128xi1>, vector<8x128xf32>
    %c0_50 = arith.constant 0 : index
    %c0_51 = arith.constant 0 : index
    %103 = vector.load %arg12[%c0_50, %c0_51] : memref<128x128xbf16, #tpu.memory_space<vmem>>, vector<128x128xbf16>
    %c0_52 = arith.constant 0 : index
    %c0_53 = arith.constant 0 : index
    %104 = vector.load %arg13[%c0_52, %c0_53] : memref<1x128xf32, #tpu.memory_space<vmem>>, vector<1x128xf32>
    %105 = arith.truncf %93 : vector<8x128xf32> to vector<8x128xbf16>
    %cst_54 = arith.constant dense<0.000000e+00> : vector<8x128xf32>
    %106 = tpu.matmul %105, %103, %cst_54 {dimension_numbers = #tpu.dot_dimension_numbers<[1], [0], [0], [1], [0, 0, 1, 1], [], []>} : vector<8x128xbf16>, vector<128x128xbf16>, vector<8x128xf32> -> vector<8x128xf32>
    %107 = vector.broadcast %104 : vector<1x128xf32> to vector<8x128xf32>
    %108 = arith.addf %106, %107 : vector<8x128xf32>
    %cst_55 = arith.constant 0.000000e+00 : f32
    %109 = vector.broadcast %cst_55 : f32 to vector<8x128xf32>
    %110 = arith.cmpf oge, %108, %109 : vector<8x128xf32>
    %cst_56 = arith.constant 2.000000e-01 : f32
    %111 = vector.broadcast %cst_56 : f32 to vector<8x128xf32>
    %112 = arith.mulf %111, %108 : vector<8x128xf32>
    %113 = arith.select %110, %108, %112 : vector<8x128xi1>, vector<8x128xf32>
    %114 = arith.truncf %102 : vector<8x128xf32> to vector<8x128xbf16>
    %cst_57 = arith.constant dense<0.000000e+00> : vector<8x128xf32>
    %115 = tpu.matmul %114, %103, %cst_57 {dimension_numbers = #tpu.dot_dimension_numbers<[1], [0], [0], [1], [0, 0, 1, 1], [], []>} : vector<8x128xbf16>, vector<128x128xbf16>, vector<8x128xf32> -> vector<8x128xf32>
    %116 = vector.broadcast %104 : vector<1x128xf32> to vector<8x128xf32>
    %117 = arith.addf %115, %116 : vector<8x128xf32>
    %cst_58 = arith.constant 0.000000e+00 : f32
    %118 = vector.broadcast %cst_58 : f32 to vector<8x128xf32>
    %119 = arith.cmpf oge, %117, %118 : vector<8x128xf32>
    %cst_59 = arith.constant 2.000000e-01 : f32
    %120 = vector.broadcast %cst_59 : f32 to vector<8x128xf32>
    %121 = arith.mulf %120, %117 : vector<8x128xf32>
    %122 = arith.select %119, %117, %121 : vector<8x128xi1>, vector<8x128xf32>
    %c0_60 = arith.constant 0 : index
    %c0_61 = arith.constant 0 : index
    %123 = vector.load %arg14[%c0_60, %c0_61] : memref<128x128xbf16, #tpu.memory_space<vmem>>, vector<128x128xbf16>
    %c0_62 = arith.constant 0 : index
    %c0_63 = arith.constant 0 : index
    %124 = vector.load %arg15[%c0_62, %c0_63] : memref<1x128xf32, #tpu.memory_space<vmem>>, vector<1x128xf32>
    %125 = arith.truncf %113 : vector<8x128xf32> to vector<8x128xbf16>
    %cst_64 = arith.constant dense<0.000000e+00> : vector<8x128xf32>
    %126 = tpu.matmul %125, %123, %cst_64 {dimension_numbers = #tpu.dot_dimension_numbers<[1], [0], [0], [1], [0, 0, 1, 1], [], []>} : vector<8x128xbf16>, vector<128x128xbf16>, vector<8x128xf32> -> vector<8x128xf32>
    %127 = vector.broadcast %124 : vector<1x128xf32> to vector<8x128xf32>
    %128 = arith.addf %126, %127 : vector<8x128xf32>
    %129 = arith.truncf %122 : vector<8x128xf32> to vector<8x128xbf16>
    %cst_65 = arith.constant dense<0.000000e+00> : vector<8x128xf32>
    %130 = tpu.matmul %129, %123, %cst_65 {dimension_numbers = #tpu.dot_dimension_numbers<[1], [0], [0], [1], [0, 0, 1, 1], [], []>} : vector<8x128xbf16>, vector<128x128xbf16>, vector<8x128xf32> -> vector<8x128xf32>
    %131 = vector.broadcast %124 : vector<1x128xf32> to vector<8x128xf32>
    %132 = arith.addf %130, %131 : vector<8x128xf32>
    %c0_66 = arith.constant 0 : index
    %c0_67 = arith.constant 0 : index
    %133 = vector.load %arg16[%c0_66, %c0_67] : memref<16x128xf32, #tpu.memory_space<vmem>>, vector<8x128xf32>
    tpu.vector_store %arg16[%c0_66, %c0_67], %128 {strides = array<i32>} : memref<16x128xf32, #tpu.memory_space<vmem>>, vector<8x128xf32>,
    %c8 = arith.constant 8 : index
    %c0_68 = arith.constant 0 : index
    %134 = vector.load %arg16[%c8, %c0_68] : memref<16x128xf32, #tpu.memory_space<vmem>>, vector<8x128xf32>
    tpu.vector_store %arg16[%c8, %c0_68], %132 {strides = array<i32>} : memref<16x128xf32, #tpu.memory_space<vmem>>, vector<8x128xf32>,
    return
  }
  func.func @transform_0(%arg0: i32) -> (i32, i32) {
    %c0_i32 = arith.constant 0 : i32
    %c0_i32_0 = arith.constant 0 : i32
    return %arg0, %c0_i32 : i32, i32
  }
  func.func @transform_1(%arg0: i32) -> (i32, i32) {
    %c0_i32 = arith.constant 0 : i32
    %c0_i32_0 = arith.constant 0 : i32
    %c0_i32_1 = arith.constant 0 : i32
    return %c0_i32, %c0_i32_0 : i32, i32
  }
  func.func @transform_2(%arg0: i32) -> (i32, i32) {
    %c0_i32 = arith.constant 0 : i32
    %c0_i32_0 = arith.constant 0 : i32
    %c0_i32_1 = arith.constant 0 : i32
    return %c0_i32, %c0_i32_0 : i32, i32
  }
  func.func @transform_3(%arg0: i32) -> (i32, i32) {
    %c0_i32 = arith.constant 0 : i32
    %c0_i32_0 = arith.constant 0 : i32
    %c0_i32_1 = arith.constant 0 : i32
    return %c0_i32, %c0_i32_0 : i32, i32
  }
  func.func @transform_4(%arg0: i32) -> (i32, i32) {
    %c0_i32 = arith.constant 0 : i32
    %c0_i32_0 = arith.constant 0 : i32
    %c0_i32_1 = arith.constant 0 : i32
    return %c0_i32, %c0_i32_0 : i32, i32
  }
  func.func @transform_5(%arg0: i32) -> (i32, i32) {
    %c0_i32 = arith.constant 0 : i32
    %c0_i32_0 = arith.constant 0 : i32
    %c0_i32_1 = arith.constant 0 : i32
    return %c0_i32, %c0_i32_0 : i32, i32
  }
  func.func @transform_6(%arg0: i32) -> (i32, i32) {
    %c0_i32 = arith.constant 0 : i32
    %c0_i32_0 = arith.constant 0 : i32
    %c0_i32_1 = arith.constant 0 : i32
    return %c0_i32, %c0_i32_0 : i32, i32
  }
  func.func @transform_7(%arg0: i32) -> (i32, i32) {
    %c0_i32 = arith.constant 0 : i32
    %c0_i32_0 = arith.constant 0 : i32
    %c0_i32_1 = arith.constant 0 : i32
    return %c0_i32, %c0_i32_0 : i32, i32
  }
  func.func @transform_8(%arg0: i32) -> (i32, i32) {
    %c0_i32 = arith.constant 0 : i32
    %c0_i32_0 = arith.constant 0 : i32
    %c0_i32_1 = arith.constant 0 : i32
    return %c0_i32, %c0_i32_0 : i32, i32
  }
  func.func @transform_9(%arg0: i32) -> (i32, i32) {
    %c0_i32 = arith.constant 0 : i32
    %c0_i32_0 = arith.constant 0 : i32
    %c0_i32_1 = arith.constant 0 : i32
    return %c0_i32, %c0_i32_0 : i32, i32
  }
  func.func @transform_10(%arg0: i32) -> (i32, i32) {
    %c0_i32 = arith.constant 0 : i32
    %c0_i32_0 = arith.constant 0 : i32
    %c0_i32_1 = arith.constant 0 : i32
    return %c0_i32, %c0_i32_0 : i32, i32
  }
  func.func @transform_11(%arg0: i32) -> (i32, i32) {
    %c0_i32 = arith.constant 0 : i32
    %c0_i32_0 = arith.constant 0 : i32
    %c0_i32_1 = arith.constant 0 : i32
    return %c0_i32, %c0_i32_0 : i32, i32
  }
  func.func @transform_12(%arg0: i32) -> (i32, i32) {
    %c0_i32 = arith.constant 0 : i32
    %c0_i32_0 = arith.constant 0 : i32
    %c0_i32_1 = arith.constant 0 : i32
    return %c0_i32, %c0_i32_0 : i32, i32
  }
  func.func @transform_13(%arg0: i32) -> (i32, i32) {
    %c0_i32 = arith.constant 0 : i32
    %c0_i32_0 = arith.constant 0 : i32
    %c0_i32_1 = arith.constant 0 : i32
    return %c0_i32, %c0_i32_0 : i32, i32
  }
  func.func @transform_14(%arg0: i32) -> (i32, i32) {
    %c0_i32 = arith.constant 0 : i32
    %c0_i32_0 = arith.constant 0 : i32
    %c0_i32_1 = arith.constant 0 : i32
    return %c0_i32, %c0_i32_0 : i32, i32
  }
  func.func @transform_15(%arg0: i32) -> (i32, i32) {
    %c0_i32 = arith.constant 0 : i32
    %c0_i32_0 = arith.constant 0 : i32
    return %arg0, %c0_i32 : i32, i32
  }
}

</mosaic_0001>

<bundles_post_ra>
// kernel: tpu_custom_call.1
= control target key start
LH: loop header
LB: loop body
LE: loop exit
PB: predicated region body
PF: predicated region fallthrough
CT: control target
= control target key end

     0   :  { %20 = vsyncpa [#allocation3], 0  ;;  %s1607_s0 = inlined_call_operand.hbm [shape: f32[16,128], index: 0, kind: input, shape index: {}]   ;;  %s1608_s1 = inlined_call_operand.hbm [shape: bf16[128,128], index: 1, kind: input, shape index: {}]   ;;  %s1609_s2 = inlined_call_operand.vmem [shape: f32[1,128], index: 2, kind: input, shape index: {}]   ;;  %s1610_s3 = inlined_call_operand.hbm [shape: bf16[128,128], index: 3, kind: input, shape index: {}]   ;;  %s1611_s4 = inlined_call_operand.vmem [shape: f32[1,128], index: 4, kind: input, shape index: {}]   ;;  %s1612_s5 = inlined_call_operand.hbm [shape: bf16[128,128], index: 5, kind: input, shape index: {}]   ;;  %s1613_s6 = inlined_call_operand.vmem [shape: f32[1,128], index: 6, kind: input, shape index: {}]   ;;  %s1614_s7 = inlined_call_operand.hbm [shape: bf16[128,128], index: 7, kind: input, shape index: {}]   ;;  %s1615_s8 = inlined_call_operand.vmem [shape: f32[1,128], index: 8, kind: input, shape index: {}]   ;;  %s1616_s9 = inlined_call_operand.hbm [shape: bf16[128,128], index: 9, kind: input, shape index: {}]   ;;  %s1617_s10 = inlined_call_operand.vmem [shape: f32[1,128], index: 10, kind: input, shape index: {}]   ;;  %s1618_s11 = inlined_call_operand.hbm [shape: bf16[128,128], index: 11, kind: input, shape index: {}]   ;;  %s1619_s12 = inlined_call_operand.vmem [shape: f32[1,128], index: 12, kind: input, shape index: {}]   ;;  %s1620_s13 = inlined_call_operand.hbm [shape: bf16[128,128], index: 13, kind: input, shape index: {}]   ;;  %s1621_s14 = inlined_call_operand.vmem [shape: f32[1,128], index: 14, kind: input, shape index: {}]   ;;  %s1622_s15 = inlined_call_operand.hbm [shape: f32[16,128], index: 15, kind: output, shape index: {}]  }
   0x1   :  { %21 = vsyncpa [#allocation6], 0 }
   0x2   :  { %22 = vsyncpa [#allocation9], 0 }
   0x3   :  { %23 = vsyncpa [#allocation12], 0 }
   0x4   :  { %24 = vsyncpa [#allocation15], 0  ;;  %s43_s20 = sshll.u32 %s1608_s1, 4  ;;  %s44_s20 = int_to_ptr.hbm [resolvable:$true] %s43_s20 }
   0x5   :  { %25 = vsyncpa [#allocation4], 0  ;;  %s1439_s21 = smov [#allocation5]   ;;  %s73_s25 = sshll.u32 %s1612_s5, 4  ;;  %s74_s25 = int_to_ptr.hbm [resolvable:$true] %s73_s25 }
   0x6   :  { %s45_s22 = sshll.u32 %s1439_s21, 4  ;;  %s1440_s26 = smov 64   ;;  %s46_s22 = int_to_ptr.vmem [resolvable:$true] %s45_s22 }
   0x7   :  { %s1441_s27 = smov 4   ;;  %s1442_s28 = smov [#allocation8]  }
   0x8   :  { %51 = dma.hbm_to_vmem [thread:$0]  %s44_s20, 1024, %s46_s22, [#allocation6], %s1440_s26, %s1440_s26, %s1441_s27  }
   0x9   :  { %s75_s29 = sshll.u32 %s1442_s28, 4  ;;  %s103_s16 = sshll.u32 %s1616_s9, 4  ;;  %s76_s29 = int_to_ptr.vmem [resolvable:$true] %s75_s29  ;;  %s104_s16 = int_to_ptr.hbm [resolvable:$true] %s103_s16 }
   0xa   :  { %81 = dma.hbm_to_vmem [thread:$0]  %s74_s25, 1024, %s76_s29, [#allocation9], %s1440_s26, %s1440_s26, %s1441_s27  }
   0xb   :  { %s30_s18 = sshll.u32 %s1607_s0, 4  ;;  %s1443_s19 = smov [#allocation11]   ;;  %s31_s18 = int_to_ptr.hbm [resolvable:$true] %s30_s18 }
   0xc   :  { %s105_s21 = sshll.u32 %s1443_s19, 4  ;;  %s1444_s20 = smov [#allocation2]   ;;  %s106_s21 = int_to_ptr.vmem [resolvable:$true] %s105_s21 }
   0xd   :  { %111 = dma.hbm_to_vmem [thread:$0]  %s104_s16, 1024, %s106_s21, [#allocation12], %s1440_s26, %s1440_s26, %s1441_s27  }
   0xe   :  { %s32_s9 = sshll.u32 %s1444_s20, 4  ;;  %s1445_s22 = smov 128   ;;  %s33_s9 = int_to_ptr.vmem [resolvable:$true] %s32_s9 }
   0xf   :  { %s1446_s23 = smov 8   ;;  %s58_s0 = sshll.u32 %s1610_s3, 4  ;;  %s59_s0 = int_to_ptr.hbm [resolvable:$true] %s58_s0 }
  0x10   :  { %38 = dma.hbm_to_vmem [thread:$0]  %s31_s18, 256, %s33_s9, [#allocation3], %s1445_s22, %s1445_s22, %s1446_s23  }
  0x11   :  { %s1447_s28 = smov [#allocation7]   ;;  %s88_s16 = sshll.u32 %s1614_s7, 4  ;;  %s89_s16 = int_to_ptr.hbm [resolvable:$true] %s88_s16 }
  0x12   :  { %s60_s29 = sshll.u32 %s1447_s28, 4  ;;  %s1448_s5 = smov [#allocation10]   ;;  %s61_s29 = int_to_ptr.vmem [resolvable:$true] %s60_s29 }
  0x13   :  { %66 = dma.hbm_to_vmem [thread:$0]  %s59_s0, 1024, %s61_s29, [#allocation6], %s1440_s26, %s1440_s26, %s1441_s27  }
  0x14   :  { %s90_s17 = sshll.u32 %s1448_s5, 4  ;;  %s118_s21 = sshll.u32 %s1618_s11, 4  ;;  %s91_s17 = int_to_ptr.vmem [resolvable:$true] %s90_s17  ;;  %s119_s21 = int_to_ptr.hbm [resolvable:$true] %s118_s21 }
  0x15   :  { %96 = dma.hbm_to_vmem [thread:$0]  %s89_s16, 1024, %s91_s17, [#allocation9], %s1440_s26, %s1440_s26, %s1441_s27  }
  0x16   :  { %s133_s7 = sshll.u32 %s1620_s13, 4  ;;  %s1449_s9 = smov [#allocation13]   ;;  %s134_s7 = int_to_ptr.hbm [resolvable:$true] %s133_s7 }
  0x17   :  { %s120_s24 = sshll.u32 %s1449_s9, 4  ;;  %s1450_s25 = smov [#allocation14]   ;;  %s121_s24 = int_to_ptr.vmem [resolvable:$true] %s120_s24 }
  0x18   :  { %126 = dma.hbm_to_vmem [thread:$0]  %s119_s21, 1024, %s121_s24, [#allocation12], %s1440_s26, %s1440_s26, %s1441_s27  }
  0x19   :  { %s135_s11 = sshll.u32 %s1450_s25, 4  ;;  %s136_s11 = int_to_ptr.vmem [resolvable:$true] %s135_s11 }
  0x1a   :  { %141 = dma.hbm_to_vmem [thread:$0]  %s134_s7, 1024, %s136_s11, [#allocation15], %s1440_s26, %s1440_s26, %s1441_s27  }
  0x1b   :  { %1427 = dma.done.wait [#allocation3], 256  }
  0x1c   :  { %1428 = vsyncadd [#allocation3], 4294967040 }
  0x1d   :  { %1429 = dma.done.wait [#allocation6], 2048  }
  0x1e   :  { %1430 = vsyncadd [#allocation6], 4294965248 }
  0x1f   :  { %1431 = dma.done.wait [#allocation9], 2048  }
  0x20   :  { %1432 = vsyncadd [#allocation9], 4294965248 }
  0x21   :  { %1433 = dma.done.wait [#allocation12], 2048  }
  0x22   :  { %1434 = vsyncadd [#allocation12], 4294965248 }
  0x23   :  { %1435 = dma.done.wait [#allocation15], 1024  }
  0x24   :  { %1436 = vsyncadd [#allocation15], 4294966272  ;;  %v1142_v0 = vld [vmem:[#allocation5 + $0x38] sm:$0xff]  ;;  %v1141_v1 = vld [vmem:[#allocation5 + $0x30] sm:$0xff]  ;;  %s894_s19 = sshll.u32 %s1622_s15, 4  ;;  %s895_s19 = int_to_ptr.hbm [resolvable:$true] %s894_s19 }
  0x25   :  { %247 = vmatpush.bf16.msra.mxu0 %v1142_v0  ;;  %264 = vmatpush.bf16.msra.mxu1 %v1142_v0  ;;  %v1150_v2 = vld [vmem:[#allocation7 + $0x38] sm:$0xff]  ;;  %v1140_v3 = vld [vmem:[#allocation5 + $0x28] sm:$0xff]  ;;  %v1149_v4 = vld [vmem:[#allocation7 + $0x30] sm:$0xff] }
  0x26   :  { %349 = vmatpush.bf16.msra.mxu2 %v1150_v2  ;;  %366 = vmatpush.bf16.msra.mxu3 %v1150_v2  ;;  %v1148_v5 = vld [vmem:[#allocation7 + $0x28] sm:$0xff]  ;;  %v1139_v6 = vld [vmem:[#allocation5 + $0x20] sm:$0xff]  ;;  %v1138_v8 = vld [vmem:[#allocation5 + $0x18] sm:$0xff] }
  0x27   :  { %v1147_v7 = vld [vmem:[#allocation7 + $0x20] sm:$0xff]  ;;  %v1146_v9 = vld [vmem:[#allocation7 + $0x18] sm:$0xff]  ;;  %v1137_v10 = vld [vmem:[#allocation5 + $0x10] sm:$0xff] }
  0x28   :  { %v1145_v11 = vld [vmem:[#allocation7 + $0x10] sm:$0xff]  ;;  %v1136_v12 = vld [vmem:[#allocation5 + $0x8] sm:$0xff]  ;;  %v1135_v13 = vld [vmem:[#allocation5] sm:$0xff] }
  0x29   :  { %248 = vmatpush.bf16.msra.mxu0 %v1141_v1  ;;  %265 = vmatpush.bf16.msra.mxu1 %v1141_v1  ;;  %v176_v14 = vld [vmem:[#allocation2] sm:$0xff]  ;;  %v177_v15 = vld [vmem:[#allocation2 + $0x8] sm:$0xff]  ;;  %v1144_v18 = vld [vmem:[#allocation7 + $0x8] sm:$0xff] }
  0x2a   :  { %350 = vmatpush.bf16.msra.mxu2 %v1149_v4  ;;  %367 = vmatpush.bf16.msra.mxu3 %v1149_v4  ;;  %v195_v16 = vpack.c.bf16 %v176_v14, %v176_v14  ;;  %v263_v17 = vpack.c.bf16 %v177_v15, %v177_v15  ;;  %v1143_v19 = vld [vmem:[#allocation7] sm:$0xff]  ;;  %v1158_v20 = vld [vmem:[#allocation8 + $0x38] sm:$0xff]  ;;  %v1157_v21 = vld [vmem:[#allocation8 + $0x30] sm:$0xff] }
  0x2b   :  { %v1156_v22 = vld [vmem:[#allocation8 + $0x28] sm:$0xff]  ;;  %v1155_v23 = vld [vmem:[#allocation8 + $0x20] sm:$0xff]  ;;  %v1154_v24 = vld [vmem:[#allocation8 + $0x18] sm:$0xff] }
  0x2c   :  { %v1153_v25 = vld [vmem:[#allocation8 + $0x10] sm:$0xff]  ;;  %v1152_v39 = vld [vmem:[#allocation8 + $0x8] sm:$0xff]  ;;  %v1151_v40 = vld [vmem:[#allocation8] sm:$0xff] }
  0x2d   :  { %249 = vmatpush.bf16.msra.mxu0 %v1140_v3  ;;  %266 = vmatpush.bf16.msra.mxu1 %v1140_v3  ;;  %v1204_v26 = vld [vmem:[%s1609_s2] ss:$0 sm:$0xff]  ;;  %v1166_v41 = vld [vmem:[#allocation10 + $0x38] sm:$0xff]  ;;  %v1164_v43 = vld [vmem:[#allocation10 + $0x28] sm:$0xff] }
  0x2e   :  { %351 = vmatpush.bf16.msra.mxu2 %v1148_v5  ;;  %368 = vmatpush.bf16.msra.mxu3 %v1148_v5  ;;  %v1165_v42 = vld [vmem:[#allocation10 + $0x30] sm:$0xff]  ;;  %v1163_v44 = vld [vmem:[#allocation10 + $0x20] sm:$0xff]  ;;  %v1162_v45 = vld [vmem:[#allocation10 + $0x18] sm:$0xff] }
  0x2f   :  { %v1161_v46 = vld [vmem:[#allocation10 + $0x10] sm:$0xff]  ;;  %v1160_v60 = vld [vmem:[#allocation10 + $0x8] sm:$0xff]  ;;  %v1159_v61 = vld [vmem:[#allocation10] sm:$0xff] }
  0x30   :  { %v1205_v47 = vld [vmem:[%s1611_s4] ss:$0 sm:$0xff]  ;;  %v1174_v62 = vld [vmem:[#allocation11 + $0x38] sm:$0xff]  ;;  %v1172_v0 = vld [vmem:[#allocation11 + $0x28] sm:$0xff] }
  0x31   :  { %250 = vmatpush.bf16.msra.mxu0 %v1139_v6  ;;  %267 = vmatpush.bf16.msra.mxu1 %v1139_v6  ;;  %v1173_v63 = vld [vmem:[#allocation11 + $0x30] sm:$0xff]  ;;  %v1171_v1 = vld [vmem:[#allocation11 + $0x20] sm:$0xff]  ;;  %v1170_v2 = vld [vmem:[#allocation11 + $0x18] sm:$0xff] }
  0x32   :  { %352 = vmatpush.bf16.msra.mxu2 %v1147_v7  ;;  %369 = vmatpush.bf16.msra.mxu3 %v1147_v7  ;;  %v1169_v3 = vld [vmem:[#allocation11 + $0x10] sm:$0xff] }
  0x33   :  { %v1206_v4 = vld [vmem:[%s1613_s6] ss:$0 sm:$0xff] }
  0x35   :  { %251 = vmatpush.bf16.msra.mxu0 %v1138_v8  ;;  %268 = vmatpush.bf16.msra.mxu1 %v1138_v8 }
  0x36   :  { %353 = vmatpush.bf16.msra.mxu2 %v1146_v9  ;;  %370 = vmatpush.bf16.msra.mxu3 %v1146_v9 }
  0x39   :  { %252 = vmatpush.bf16.msra.mxu0 %v1137_v10  ;;  %269 = vmatpush.bf16.msra.mxu1 %v1137_v10 }
  0x3a   :  { %354 = vmatpush.bf16.msra.mxu2 %v1145_v11  ;;  %371 = vmatpush.bf16.msra.mxu3 %v1145_v11 }
  0x3d   :  { %253 = vmatpush.bf16.msra.mxu0 %v1136_v12  ;;  %270 = vmatpush.bf16.msra.mxu1 %v1136_v12 }
  0x3e   :  { %355 = vmatpush.bf16.msra.mxu2 %v1144_v18  ;;  %372 = vmatpush.bf16.msra.mxu3 %v1144_v18  ;;  %v1167_v18 = vld [vmem:[#allocation11] sm:$0xff] }
  0x41   :  { %254 = vmatpush.bf16.msra.mxu0 %v1135_v13  ;;  %271 = vmatpush.bf16.msra.mxu1 %v1135_v13 }
  0x42   :  { %356 = vmatpush.bf16.msra.mxu2 %v1143_v19  ;;  %373 = vmatpush.bf16.msra.mxu3 %v1143_v19  ;;  %v1182_v19 = vld [vmem:[#allocation13 + $0x38] sm:$0xff] }
  0x44   :  { %255 = vmatmul.bf16.vlgmr.msra.gmra.mxu0 %v195_v16  ;;  %272 = vmatmul.bf16.vlgmr.msra.gmra.mxu1 %v263_v17  ;;  %v1168_v17 = vld [vmem:[#allocation11 + $0x8] sm:$0xff] }
  0x45   :  { %451 = vmatpush.bf16.msrb.mxu0 %v1158_v20  ;;  %468 = vmatpush.bf16.msrb.mxu1 %v1158_v20  ;;  %v1181_v20 = vld [vmem:[#allocation13 + $0x30] sm:$0xff] }
  0x46   :  { %553 = vmatpush.bf16.msrb.mxu2 %v1166_v41  ;;  %570 = vmatpush.bf16.msrb.mxu3 %v1166_v41  ;;  %v1189_v41 = vld [vmem:[#allocation14 + $0x30] sm:$0xff] }
  0x49   :  { %452 = vmatpush.bf16.msrb.mxu0 %v1157_v21  ;;  %469 = vmatpush.bf16.msrb.mxu1 %v1157_v21  ;;  %v1180_v21 = vld [vmem:[#allocation13 + $0x28] sm:$0xff] }
  0x4a   :  { %554 = vmatpush.bf16.msrb.mxu2 %v1165_v42  ;;  %571 = vmatpush.bf16.msrb.mxu3 %v1165_v42  ;;  %v1188_v42 = vld [vmem:[#allocation14 + $0x28] sm:$0xff] }
  0x4d   :  { %453 = vmatpush.bf16.msrb.mxu0 %v1156_v22  ;;  %470 = vmatpush.bf16.msrb.mxu1 %v1156_v22  ;;  %v1179_v22 = vld [vmem:[#allocation13 + $0x20] sm:$0xff] }
  0x4e   :  { %555 = vmatpush.bf16.msrb.mxu2 %v1164_v43  ;;  %572 = vmatpush.bf16.msrb.mxu3 %v1164_v43  ;;  %v1187_v43 = vld [vmem:[#allocation14 + $0x20] sm:$0xff] }
  0x51   :  { %454 = vmatpush.bf16.msrb.mxu0 %v1155_v23  ;;  %471 = vmatpush.bf16.msrb.mxu1 %v1155_v23  ;;  %v1178_v23 = vld [vmem:[#allocation13 + $0x18] sm:$0xff] }
  0x52   :  { %556 = vmatpush.bf16.msrb.mxu2 %v1163_v44  ;;  %573 = vmatpush.bf16.msrb.mxu3 %v1163_v44  ;;  %v1186_v44 = vld [vmem:[#allocation14 + $0x18] sm:$0xff] }
  0x55   :  { %455 = vmatpush.bf16.msrb.mxu0 %v1154_v24  ;;  %472 = vmatpush.bf16.msrb.mxu1 %v1154_v24  ;;  %v1177_v24 = vld [vmem:[#allocation13 + $0x10] sm:$0xff] }
  0x56   :  { %557 = vmatpush.bf16.msrb.mxu2 %v1162_v45  ;;  %574 = vmatpush.bf16.msrb.mxu3 %v1162_v45  ;;  %v1185_v45 = vld [vmem:[#allocation14 + $0x10] sm:$0xff] }
  0x59   :  { %456 = vmatpush.bf16.msrb.mxu0 %v1153_v25  ;;  %473 = vmatpush.bf16.msrb.mxu1 %v1153_v25  ;;  %v1207_v25 = vld [vmem:[%s1615_s8] ss:$0 sm:$0xff] }
  0x5a   :  { %558 = vmatpush.bf16.msrb.mxu2 %v1161_v46  ;;  %575 = vmatpush.bf16.msrb.mxu3 %v1161_v46  ;;  %v1208_v46 = vld [vmem:[%s1617_s10] ss:$0 sm:$0xff] }
  0x5d   :  { %457 = vmatpush.bf16.msrb.mxu0 %v1152_v39  ;;  %474 = vmatpush.bf16.msrb.mxu1 %v1152_v39  ;;  %v1175_v39 = vld [vmem:[#allocation13] sm:$0xff] }
  0x5e   :  { %559 = vmatpush.bf16.msrb.mxu2 %v1160_v60  ;;  %576 = vmatpush.bf16.msrb.mxu3 %v1160_v60  ;;  %v1183_v60 = vld [vmem:[#allocation14] sm:$0xff] }
  0x61   :  { %458 = vmatpush.bf16.msrb.mxu0 %v1151_v40  ;;  %475 = vmatpush.bf16.msrb.mxu1 %v1151_v40  ;;  %v1190_v40 = vld [vmem:[#allocation14 + $0x38] sm:$0xff] }
  0x62   :  { %560 = vmatpush.bf16.msrb.mxu2 %v1159_v61  ;;  %577 = vmatpush.bf16.msrb.mxu3 %v1159_v61  ;;  %v1209_v61 = vld [vmem:[%s1619_s12] ss:$0 sm:$0xff]  ;;  %s1451_s12 = smov [#allocation16]  }
  0x63   :  { %s892_s5 = sshll.u32 %s1451_s12, 4  ;;  %s893_s5 = int_to_ptr.vmem [resolvable:$true] %s892_s5 }
  0x65   :  { %655 = vmatpush.bf16.msra.mxu0 %v1174_v62  ;;  %672 = vmatpush.bf16.msra.mxu1 %v1174_v62 }
  0x69   :  { %656 = vmatpush.bf16.msra.mxu0 %v1173_v63  ;;  %673 = vmatpush.bf16.msra.mxu1 %v1173_v63 }
  0x6d   :  { %657 = vmatpush.bf16.msra.mxu0 %v1172_v0  ;;  %674 = vmatpush.bf16.msra.mxu1 %v1172_v0 }
  0x71   :  { %658 = vmatpush.bf16.msra.mxu0 %v1171_v1  ;;  %675 = vmatpush.bf16.msra.mxu1 %v1171_v1 }
  0x75   :  { %659 = vmatpush.bf16.msra.mxu0 %v1170_v2  ;;  %676 = vmatpush.bf16.msra.mxu1 %v1170_v2 }
  0x79   :  { %660 = vmatpush.bf16.msra.mxu0 %v1169_v3  ;;  %677 = vmatpush.bf16.msra.mxu1 %v1169_v3 }
  0x7d   :  { %661 = vmatpush.bf16.msra.mxu0 %v1168_v17  ;;  %678 = vmatpush.bf16.msra.mxu1 %v1168_v17 }
  0x81   :  { %662 = vmatpush.bf16.msra.mxu0 %v1167_v18  ;;  %679 = vmatpush.bf16.msra.mxu1 %v1167_v18 }
  0xc1   :  { %v256_v27 = vpop.f32.mrf.mxu0  ;;  %v273_v28 = vpop.f32.mrf.mxu1 }
  0xc2   :  { %v257_v29 = vadd.f32 %v1204_v26, %v256_v27  ;;  %v274_v30 = vadd.f32 %v1204_v26, %v273_v28 }
  0xc4   :  { %v261_v31 = vmul.f32 0.2, %v257_v29  ;;  %v278_v32 = vmul.f32 0.2, %v274_v30  ;;  %vm260_vm0 = vcmp.ge.f32.partialorder %v257_v29, 0.0  ;;  %vm277_vm1 = vcmp.ge.f32.partialorder %v274_v30, 0.0 }
  0xc6   :  { %v262_v33 = vsel %vm260_vm0, %v257_v29, %v261_v31  ;;  %v279_v34 = vsel %vm277_vm1, %v274_v30, %v278_v32 }
  0xc7   :  { %v297_v35 = vpack.c.bf16 %v262_v33, %v262_v33  ;;  %v365_v36 = vpack.c.bf16 %v279_v34, %v279_v34 }
  0xc9   :  { %v258_v37 = vpop.f32.mrf.mxu0  ;;  %v275_v38 = vpop.f32.mrf.mxu1  ;;  %357 = vmatmul.bf16.vlgmr.msra.gmra.mxu2 %v297_v35  ;;  %374 = vmatmul.bf16.vlgmr.msra.gmra.mxu3 %v365_v36 }
  0xca   :  { %757 = vmatpush.bf16.msra.mxu2 %v1182_v19  ;;  %774 = vmatpush.bf16.msra.mxu3 %v1182_v19  ;;  %v1176_v38 = vld [vmem:[#allocation13 + $0x8] sm:$0xff] }
  0xce   :  { %758 = vmatpush.bf16.msra.mxu2 %v1181_v20  ;;  %775 = vmatpush.bf16.msra.mxu3 %v1181_v20 }
  0xd2   :  { %759 = vmatpush.bf16.msra.mxu2 %v1180_v21  ;;  %776 = vmatpush.bf16.msra.mxu3 %v1180_v21 }
  0xd6   :  { %760 = vmatpush.bf16.msra.mxu2 %v1179_v22  ;;  %777 = vmatpush.bf16.msra.mxu3 %v1179_v22 }
  0xda   :  { %761 = vmatpush.bf16.msra.mxu2 %v1178_v23  ;;  %778 = vmatpush.bf16.msra.mxu3 %v1178_v23 }
  0xde   :  { %762 = vmatpush.bf16.msra.mxu2 %v1177_v24  ;;  %779 = vmatpush.bf16.msra.mxu3 %v1177_v24 }
  0xe2   :  { %763 = vmatpush.bf16.msra.mxu2 %v1176_v38  ;;  %780 = vmatpush.bf16.msra.mxu3 %v1176_v38 }
  0xe6   :  { %764 = vmatpush.bf16.msra.mxu2 %v1175_v39  ;;  %781 = vmatpush.bf16.msra.mxu3 %v1175_v39 }
 0x14c   :  { %v358_v48 = vpop.f32.mrf.mxu2  ;;  %v375_v49 = vpop.f32.mrf.mxu3 }
 0x14d   :  { %v359_v50 = vadd.f32 %v1205_v47, %v358_v48  ;;  %v376_v51 = vadd.f32 %v1205_v47, %v375_v49 }
 0x14f   :  { %vm362_vm2 = vcmp.ge.f32.partialorder %v359_v50, 0.0  ;;  %v363_v52 = vmul.f32 0.2, %v359_v50  ;;  %vm379_vm3 = vcmp.ge.f32.partialorder %v376_v51, 0.0  ;;  %v380_v53 = vmul.f32 0.2, %v376_v51 }
 0x151   :  { %v364_v54 = vsel %vm362_vm2, %v359_v50, %v363_v52  ;;  %v381_v55 = vsel %vm379_vm3, %v376_v51, %v380_v53 }
 0x152   :  { %v399_v56 = vpack.c.bf16 %v364_v54, %v364_v54  ;;  %v467_v57 = vpack.c.bf16 %v381_v55, %v381_v55 }
 0x154   :  { %v360_v58 = vpop.f32.mrf.mxu2  ;;  %v377_v59 = vpop.f32.mrf.mxu3  ;;  %459 = vmatmul.bf16.vlgmr.msrb.gmra.mxu0 %v399_v56  ;;  %476 = vmatmul.bf16.vlgmr.msrb.gmra.mxu1 %v467_v57 }
 0x155   :  { %859 = vmatpush.bf16.msrb.mxu0 %v1190_v40  ;;  %873 = vmatpush.bf16.msrb.mxu1 %v1190_v40  ;;  %v1184_v59 = vld [vmem:[#allocation14 + $0x8] sm:$0xff] }
 0x159   :  { %860 = vmatpush.bf16.msrb.mxu0 %v1189_v41  ;;  %874 = vmatpush.bf16.msrb.mxu1 %v1189_v41 }
 0x15d   :  { %861 = vmatpush.bf16.msrb.mxu0 %v1188_v42  ;;  %875 = vmatpush.bf16.msrb.mxu1 %v1188_v42 }
 0x161   :  { %862 = vmatpush.bf16.msrb.mxu0 %v1187_v43  ;;  %876 = vmatpush.bf16.msrb.mxu1 %v1187_v43 }
 0x165   :  { %863 = vmatpush.bf16.msrb.mxu0 %v1186_v44  ;;  %877 = vmatpush.bf16.msrb.mxu1 %v1186_v44 }
 0x169   :  { %864 = vmatpush.bf16.msrb.mxu0 %v1185_v45  ;;  %878 = vmatpush.bf16.msrb.mxu1 %v1185_v45 }
 0x16d   :  { %865 = vmatpush.bf16.msrb.mxu0 %v1184_v59  ;;  %879 = vmatpush.bf16.msrb.mxu1 %v1184_v59 }
 0x171   :  { %866 = vmatpush.bf16.msrb.mxu0 %v1183_v60  ;;  %880 = vmatpush.bf16.msrb.mxu1 %v1183_v60 }
 0x1d1   :  { %v460_v5 = vpop.f32.mrf.mxu0  ;;  %v477_v6 = vpop.f32.mrf.mxu1 }
 0x1d2   :  { %v461_v7 = vadd.f32 %v1206_v4, %v460_v5  ;;  %v478_v8 = vadd.f32 %v1206_v4, %v477_v6 }
 0x1d4   :  { %vm464_vm4 = vcmp.ge.f32.partialorder %v461_v7, 0.0  ;;  %v465_v9 = vmul.f32 0.2, %v461_v7  ;;  %vm481_vm5 = vcmp.ge.f32.partialorder %v478_v8, 0.0  ;;  %v482_v10 = vmul.f32 0.2, %v478_v8 }
 0x1d6   :  { %v466_v11 = vsel %vm464_vm4, %v461_v7, %v465_v9  ;;  %v483_v12 = vsel %vm481_vm5, %v478_v8, %v482_v10  ;;  %v1210_v10 = vld [vmem:[%s1621_s14] ss:$0 sm:$0xff] }
 0x1d7   :  { %v501_v13 = vpack.c.bf16 %v466_v11, %v466_v11  ;;  %v569_v14 = vpack.c.bf16 %v483_v12, %v483_v12 }
 0x1d9   :  { %v462_v15 = vpop.f32.mrf.mxu0  ;;  %v479_v16 = vpop.f32.mrf.mxu1  ;;  %561 = vmatmul.bf16.vlgmr.msrb.gmra.mxu2 %v501_v13  ;;  %578 = vmatmul.bf16.vlgmr.msrb.gmra.mxu3 %v569_v14 }
 0x25c   :  { %v562_v26 = vpop.f32.mrf.mxu2  ;;  %v579_v27 = vpop.f32.mrf.mxu3 }
 0x25d   :  { %v563_v28 = vadd.f32 %v1207_v25, %v562_v26  ;;  %v580_v29 = vadd.f32 %v1207_v25, %v579_v27 }
 0x25f   :  { %vm566_vm6 = vcmp.ge.f32.partialorder %v563_v28, 0.0  ;;  %v567_v30 = vmul.f32 0.2, %v563_v28  ;;  %vm583_vm7 = vcmp.ge.f32.partialorder %v580_v29, 0.0  ;;  %v584_v31 = vmul.f32 0.2, %v580_v29 }
 0x261   :  { %v568_v32 = vsel %vm566_vm6, %v563_v28, %v567_v30  ;;  %v585_v33 = vsel %vm583_vm7, %v580_v29, %v584_v31 }
 0x262   :  { %v603_v34 = vpack.c.bf16 %v568_v32, %v568_v32  ;;  %v671_v35 = vpack.c.bf16 %v585_v33, %v585_v33 }
 0x264   :  { %v564_v36 = vpop.f32.mrf.mxu2  ;;  %v581_v37 = vpop.f32.mrf.mxu3  ;;  %663 = vmatmul.bf16.vlgmr.msra.gmra.mxu0 %v603_v34  ;;  %680 = vmatmul.bf16.vlgmr.msra.gmra.mxu1 %v671_v35 }
 0x2e1   :  { %v664_v47 = vpop.f32.mrf.mxu0  ;;  %v681_v48 = vpop.f32.mrf.mxu1 }
 0x2e2   :  { %v665_v49 = vadd.f32 %v1208_v46, %v664_v47  ;;  %v682_v50 = vadd.f32 %v1208_v46, %v681_v48 }
 0x2e4   :  { %vm668_vm8 = vcmp.ge.f32.partialorder %v665_v49, 0.0  ;;  %v669_v51 = vmul.f32 0.2, %v665_v49  ;;  %vm685_vm9 = vcmp.ge.f32.partialorder %v682_v50, 0.0  ;;  %v686_v52 = vmul.f32 0.2, %v682_v50 }
 0x2e6   :  { %v670_v53 = vsel %vm668_vm8, %v665_v49, %v669_v51  ;;  %v687_v54 = vsel %vm685_vm9, %v682_v50, %v686_v52 }
 0x2e7   :  { %v705_v55 = vpack.c.bf16 %v670_v53, %v670_v53  ;;  %v773_v56 = vpack.c.bf16 %v687_v54, %v687_v54 }
 0x2e9   :  { %v666_v57 = vpop.f32.mrf.mxu0  ;;  %v683_v58 = vpop.f32.mrf.mxu1  ;;  %765 = vmatmul.bf16.vlgmr.msra.gmra.mxu2 %v705_v55  ;;  %782 = vmatmul.bf16.vlgmr.msra.gmra.mxu3 %v773_v56 }
 0x36c   :  { %v766_v62 = vpop.f32.mrf.mxu2  ;;  %v783_v63 = vpop.f32.mrf.mxu3 }
 0x36d   :  { %v767_v0 = vadd.f32 %v1209_v61, %v766_v62  ;;  %v784_v1 = vadd.f32 %v1209_v61, %v783_v63 }
 0x36f   :  { %vm770_vm10 = vcmp.ge.f32.partialorder %v767_v0, 0.0  ;;  %v771_v2 = vmul.f32 0.2, %v767_v0  ;;  %vm787_vm11 = vcmp.ge.f32.partialorder %v784_v1, 0.0  ;;  %v788_v3 = vmul.f32 0.2, %v784_v1 }
 0x371   :  { %v772_v4 = vsel %vm770_vm10, %v767_v0, %v771_v2  ;;  %v789_v5 = vsel %vm787_vm11, %v784_v1, %v788_v3 }
 0x372   :  { %v807_v6 = vpack.c.bf16 %v772_v4, %v772_v4  ;;  %v872_v7 = vpack.c.bf16 %v789_v5, %v789_v5 }
 0x374   :  { %v768_v8 = vpop.f32.mrf.mxu2  ;;  %v785_v9 = vpop.f32.mrf.mxu3  ;;  %867 = vmatmul.bf16.vlgmr.msrb.gmra.mxu0 %v807_v6  ;;  %881 = vmatmul.bf16.vlgmr.msrb.gmra.mxu1 %v872_v7 }
 0x3f1   :  { %v868_v11 = vpop.f32.mrf.mxu0  ;;  %v882_v12 = vpop.f32.mrf.mxu1 }
 0x3f2   :  { %v869_v13 = vadd.f32 %v1210_v10, %v868_v11  ;;  %v883_v14 = vadd.f32 %v1210_v10, %v882_v12 }
 0x3f4   :  { %886 = vst [vmem:[#allocation16] sm:$0xff] %v869_v13 }
 0x3f5   :  { %887 = vst [vmem:[#allocation16 + $0x8] sm:$0xff] %v883_v14 }
 0x3f6   :  { %900 = dma.vmem_to_hbm [thread:$0]  %s893_s5, 256, %s895_s19, [#allocation4], %s1445_s22, %s1445_s22, %s1446_s23  }
 0x3f9   :  { %v870_v15 = vpop.f32.mrf.mxu0  ;;  %v884_v16 = vpop.f32.mrf.mxu1 }
 0x3fa   :  { %1437 = dma.done.wait [#allocation4], 256  }
 0x3fb   :  { %1438 = vsyncadd [#allocation4], 4294967040 }
 0x3fc   :  { %905 = vsyncpa [#allocation3], 1 }
 0x3fd   :  { %906 = vsyncpa [#allocation6], 1 }
 0x3fe   :  { %907 = vsyncpa [#allocation9], 1 }
 0x3ff   :  { %908 = vsyncpa [#allocation12], 1 }
 0x400   :  { %909 = vsyncpa [#allocation15], 1 }
 0x401   :  { %910 = vsyncpa [#allocation4], 1 }

</bundles_post_ra>
